<compile_context>
chip_gen: v7x
topology: tpu7x:2x2x1
jax: 0.10.0
libtpu: 0.0.40
codegen_flags: <defaults>
</compile_context>

<pallas_src>
import functools

import jax
import jax.numpy as jnp
from jax.experimental import pallas as pl
from jax.experimental.pallas import tpu as pltpu


def _round_up(x, m):
    return ((x + m - 1) // m) * m


def _leaky_relu(h, slope=0.01):
    return jnp.where(h >= 0, h, slope * h)


def _mlp_kernel(x_ref, *refs, n_layers, out_dim, negative_slope):
    """refs = (w1T, b1, ..., wLT, bL, o_ref).  Full MLP for one batch tile.

    Transposed layout: activations are (features, TB) with the batch on the
    128-wide lane axis, so every tile is lane-dense and the final store needs
    no padding.  Weights arrive pre-transposed as (d_out, d_in).
    """
    o_ref = refs[-1]

    h = x_ref[...]                                   # (n_in, TB)
    for i in range(n_layers):
        wT = refs[2 * i][...]                        # (d_out, d_in)
        b = refs[2 * i + 1][...]                     # (d_out, 1), always f32
        rhs = h if h.dtype == wT.dtype else h.astype(wT.dtype)
        # MXU matmul with f32 accumulation; bias add / activation on the VPU in f32.
        h = jnp.dot(wT, rhs, preferred_element_type=jnp.float32) + b
        if i < n_layers - 1:
            h = _leaky_relu(h, negative_slope)
            # TODO(synk): Dropout(r_drop=0) is identity; non-zero p would need pltpu.prng_*.

    if out_dim == 1:
        # LogSoftmax over a single column is identically 0; `h - h` keeps NaN/Inf
        # propagation while skipping the exp/log/reduce entirely.
        o_ref[...] = (h - h).astype(o_ref.dtype)
    else:
        # Log-softmax over the feature axis (a <=8-row sublane reduce).
        m = jnp.max(h, axis=0, keepdims=True)                                # (1, TB)
        lse = m + jnp.log(jnp.sum(jnp.exp(h - m), axis=0, keepdims=True))
        o_ref[...] = (h - lse).astype(o_ref.dtype)


def mlp_forward(x, params, *, block_rows=4096, param_dtype=None,
                negative_slope=0.01, core_parallel=False):
    """x: (batch, ...) flattened to (batch, n_in).
    params: list of (W, b); W is (in, out), b is (1, out) or (out,), both f32.
    param_dtype: optional storage dtype (e.g. jnp.bfloat16) for x and W; valid on
                 all generations (only the MXU sees it), matmul inputs are cast
                 each layer, accumulation + elementwise math stay f32.  The win
                 is tiny for this network (x+W are a few KiB).
    core_parallel: use pltpu.CORE_PARALLEL on the batch-tile axis (v7x, 2 TCs).
    """
    batch = x.shape[0]
    x2d = x.reshape(batch, -1).astype(jnp.float32)   # matches x.view(batch_size, -1)
    n_in = x2d.shape[1]
    n_layers = len(params)
    out_dim = params[-1][0].shape[1]

    # --- batch tiling: batch lives on the lane axis ---------------------------
    # Per-grid-step fixed cost (~0.35us) dominates this tiny network, so keep the
    # grid small; prefer exactly 2 steps for small batches so both TensorCores
    # get work on v7x.  Hard cap keeps padded activations well inside VMEM.
    tb_cap = min(_round_up(block_rows, 128), 16384)
    tb_two_steps = _round_up((batch + 1) // 2, 128)
    tb = max(128, min(tb_cap, tb_two_steps))
    batch_p = _round_up(batch, tb)
    grid = (batch_p // tb,)

    xT = x2d.T                                       # (n_in, batch): lane-dense DMA rows
    if batch_p != batch:
        xT = jnp.pad(xT, ((0, 0), (0, batch_p - batch)))

    # Weights pre-transposed to (d_out, d_in); biases as (d_out, 1) columns
    # (broadcast over the lane/batch axis inside the kernel).
    wTs = [w.astype(jnp.float32).T for w, _ in params]
    bs = [b.astype(jnp.float32).reshape(-1, 1) for _, b in params]

    if param_dtype is not None:
        xT = xT.astype(param_dtype)
        wTs = [w.astype(param_dtype) for w in wTs]   # biases stay f32 (added post-accum)

    flat_args = [xT]
    for wT, b in zip(wTs, bs):
        flat_args += [wT, b]

    in_specs = [pl.BlockSpec((n_in, tb), lambda i: (0, i))]
    for wT, b in zip(wTs, bs):
        # Weights/biases are tiny: keep them fully resident (constant block index).
        # TODO(synk): pipeline_mode=pl.Buffered(1) would trim their per-step
        # double-buffer bookkeeping; left at the default for portability.
        in_specs.append(pl.BlockSpec(wT.shape, lambda i: (0, 0)))
        in_specs.append(pl.BlockSpec(b.shape, lambda i: (0, 0)))
    out_specs = pl.BlockSpec((out_dim, tb), lambda i: (0, i))

    # --- scheduler hints: this kernel is overhead/memory bound ----------------
    dims_chain = [n_in] + [wT.shape[0] for wT in wTs]
    flops = 2 * batch_p * sum(d0 * d1 for d0, d1 in zip(dims_chain[:-1], dims_chain[1:]))
    transcendentals = 0 if out_dim == 1 else batch_p * (out_dim + 1)
    bytes_accessed = (xT.size * xT.dtype.itemsize
                      + sum(w.size * w.dtype.itemsize for w in wTs)
                      + sum(b.size * b.dtype.itemsize for b in bs)
                      + batch_p * out_dim * 4)

    # --- VMEM budget from *padded* ((8,128)-tiled) buffer sizes ---------------
    def _padded_bytes(shape, itemsize):
        return _round_up(shape[-2], 8) * _round_up(shape[-1], 128) * itemsize

    vmem_est = (2 * _padded_bytes((n_in, tb), xT.dtype.itemsize)            # x: 2 bufs
                + 2 * _padded_bytes((out_dim, tb), 4)                       # out: 2 bufs
                + 2 * sum(_padded_bytes(w.shape, w.dtype.itemsize) for w in wTs)
                + 2 * sum(_padded_bytes(b.shape, 4) for b in bs)
                + 6 * _padded_bytes((max(dims_chain), tb), 4))              # live activations
    vmem_limit = int(min(32 * 2**20, max(4 * 2**20, 2 * vmem_est)))         # <= half v7x physical

    dim_sem = (pltpu.CORE_PARALLEL if core_parallel else "parallel",)

    kernel = functools.partial(_mlp_kernel, n_layers=n_layers, out_dim=out_dim,
                               negative_slope=negative_slope)

    out = pl.pallas_call(
        kernel,
        grid=grid,
        in_specs=in_specs,
        out_specs=out_specs,
        out_shape=jax.ShapeDtypeStruct((out_dim, batch_p), jnp.float32),
        compiler_params=pltpu.CompilerParams(
            dimension_semantics=dim_sem,
            vmem_limit_bytes=vmem_limit),
        cost_estimate=pl.CostEstimate(flops=flops,
                                      transcendentals=transcendentals,
                                      bytes_accessed=bytes_accessed),
    )(*flat_args)

    # TODO(synk): output_dim > 1 path (view(batch, -1, output_dim) before
    # LogSoftmax(dim=1)) is not implemented; the module default is output_dim == 1.
    return out[:, :batch].T                          # back to (batch, out_dim)


def init_params(key, dims):
    """Deterministic init, weights (in, out), bias (1, out) — mirrors nn.Linear fan-in init."""
    params = []
    for i in range(len(dims) - 1):
        key, kw, kb = jax.random.split(key, 3)
        bound = 1.0 / jnp.sqrt(dims[i])
        w = jax.random.uniform(kw, (dims[i], dims[i + 1]), jnp.float32, -bound, bound)
        b = jax.random.uniform(kb, (1, dims[i + 1]), jnp.float32, -bound, bound)
        params.append((w, b))
    return params


def mlp_ref(x, params):
    """Pure-JAX reference for correctness check."""
    h = x.reshape(x.shape[0], -1)
    n = len(params)
    for i, (w, b) in enumerate(params):
        h = h @ w + b
        if i < n - 1:
            h = _leaky_relu(h)
    m = jnp.max(h, axis=1, keepdims=True)
    return h - (m + jnp.log(jnp.sum(jnp.exp(h - m), axis=1, keepdims=True)))


if __name__ == "__main__":
    key = jax.random.PRNGKey(0)

    # Config 1: module defaults — dims [3, 32, 32, 32, 1]; tile sizing yields a
    # 2-step grid (tb=512) so the batch axis can shard across TCs.
    dims1 = [3, 32, 32, 32, 1]
    batch1 = 1024
    key, kx1, kp1 = jax.random.split(key, 3)
    x1 = jax.random.normal(kx1, (batch1, dims1[0]), jnp.float32)
    params1 = init_params(kp1, dims1)
    out1 = jax.block_until_ready(mlp_forward(x1, params1))
    ref1 = mlp_ref(x1, params1)
    assert out1.shape == (batch1, dims1[-1]), out1.shape
    assert jnp.allclose(out1, ref1, atol=1e-5, rtol=1e-5)

    # Config 2: n_feature_out=4 (non-trivial log-softmax) + batch not a multiple of
    # the tile -> exercises the sublane log-softmax and the batch padding/slicing path.
    dims2 = [3, 32, 32, 32, 4]
    batch2 = 200
    key, kx2, kp2 = jax.random.split(key, 3)
    x2 = jax.random.normal(kx2, (batch2, dims2[0]), jnp.float32)
    params2 = init_params(kp2, dims2)
    out2 = jax.block_until_ready(mlp_forward(x2, params2))
    ref2 = mlp_ref(x2, params2)
    assert out2.shape == (batch2, dims2[-1]), out2.shape
    assert jnp.allclose(out2, ref2, atol=1e-5, rtol=1e-5)

    # Config 3: bf16 storage path; f32 accumulation, loose tolerance (h is re-cast
    # to bf16 before each layer's matmul, so rounding compounds across layers).
    out3 = jax.block_until_ready(
        mlp_forward(x2, params2, param_dtype=jnp.bfloat16))
    assert out3.shape == (batch2, dims2[-1]), out3.shape
    assert bool(jnp.isfinite(out3).all())
    assert jnp.allclose(out3, ref2, atol=2e-1, rtol=2e-1)

    print("KERNEL_OK")
</pallas_src>

<mosaic_0001>
module attributes {stable_mosaic.version = 11 : i64} {
  func.func @_mlp_kernel(%arg0: i32, %arg1: memref<3x512xf32, #tpu.memory_space<vmem>>, %arg2: memref<32x3xf32, #tpu.memory_space<vmem>>, %arg3: memref<32x1xf32, #tpu.memory_space<vmem>>, %arg4: memref<32x32xf32, #tpu.memory_space<vmem>>, %arg5: memref<32x1xf32, #tpu.memory_space<vmem>>, %arg6: memref<32x32xf32, #tpu.memory_space<vmem>>, %arg7: memref<32x1xf32, #tpu.memory_space<vmem>>, %arg8: memref<1x32xf32, #tpu.memory_space<vmem>>, %arg9: memref<1x1xf32, #tpu.memory_space<vmem>>, %arg10: memref<1x512xf32, #tpu.memory_space<vmem>>) attributes {dimension_semantics = [#tpu.dimension_semantics<parallel>], iteration_bounds = array<i64: 2>, scalar_prefetch = 0 : i64, scratch_operands = 0 : i64, tpu.core_type = #tpu.core_type<tc>, window_params = [{transform_indices = @transform_0, window_bounds = array<i64: 3, 512>}, {pipeline_mode = #tpu.pipeline_mode<synchronous>, transform_indices = @transform_1, window_bounds = array<i64: 32, 3>}, {pipeline_mode = #tpu.pipeline_mode<synchronous>, transform_indices = @transform_2, window_bounds = array<i64: 32, 1>}, {pipeline_mode = #tpu.pipeline_mode<synchronous>, transform_indices = @transform_3, window_bounds = array<i64: 32, 32>}, {pipeline_mode = #tpu.pipeline_mode<synchronous>, transform_indices = @transform_4, window_bounds = array<i64: 32, 1>}, {pipeline_mode = #tpu.pipeline_mode<synchronous>, transform_indices = @transform_5, window_bounds = array<i64: 32, 32>}, {pipeline_mode = #tpu.pipeline_mode<synchronous>, transform_indices = @transform_6, window_bounds = array<i64: 32, 1>}, {pipeline_mode = #tpu.pipeline_mode<synchronous>, transform_indices = @transform_7, window_bounds = array<i64: 1, 32>}, {pipeline_mode = #tpu.pipeline_mode<synchronous>, transform_indices = @transform_8, window_bounds = array<i64: 1, 1>}, {transform_indices = @transform_9, window_bounds = array<i64: 1, 512>}]} {
    %c0 = arith.constant 0 : index
    %c0_0 = arith.constant 0 : index
    %0 = vector.load %arg1[%c0, %c0_0] : memref<3x512xf32, #tpu.memory_space<vmem>>, vector<3x512xf32>
    %c0_1 = arith.constant 0 : index
    %c0_2 = arith.constant 0 : index
    %1 = vector.load %arg2[%c0_1, %c0_2] : memref<32x3xf32, #tpu.memory_space<vmem>>, vector<32x3xf32>
    %c0_3 = arith.constant 0 : index
    %c0_4 = arith.constant 0 : index
    %2 = vector.load %arg3[%c0_3, %c0_4] : memref<32x1xf32, #tpu.memory_space<vmem>>, vector<32x1xf32>
    %cst = arith.constant dense<0.000000e+00> : vector<32x512xf32>
    %3 = tpu.matmul %1, %0, %cst {dimension_numbers = #tpu.dot_dimension_numbers<[1], [0], [0], [1], [0, 0, 1, 1], [], []>} : vector<32x3xf32>, vector<3x512xf32>, vector<32x512xf32> -> vector<32x512xf32>
    %4 = vector.broadcast %2 : vector<32x1xf32> to vector<32x512xf32>
    %5 = arith.addf %3, %4 : vector<32x512xf32>
    %cst_5 = arith.constant 0.000000e+00 : f32
    %6 = vector.broadcast %cst_5 : f32 to vector<32x512xf32>
    %7 = arith.cmpf oge, %5, %6 : vector<32x512xf32>
    %cst_6 = arith.constant 0.00999999977 : f32
    %8 = vector.broadcast %cst_6 : f32 to vector<32x512xf32>
    %9 = arith.mulf %8, %5 : vector<32x512xf32>
    %10 = arith.select %7, %5, %9 : vector<32x512xi1>, vector<32x512xf32>
    %c0_7 = arith.constant 0 : index
    %c0_8 = arith.constant 0 : index
    %11 = vector.load %arg4[%c0_7, %c0_8] : memref<32x32xf32, #tpu.memory_space<vmem>>, vector<32x32xf32>
    %c0_9 = arith.constant 0 : index
    %c0_10 = arith.constant 0 : index
    %12 = vector.load %arg5[%c0_9, %c0_10] : memref<32x1xf32, #tpu.memory_space<vmem>>, vector<32x1xf32>
    %cst_11 = arith.constant dense<0.000000e+00> : vector<32x512xf32>
    %13 = tpu.matmul %11, %10, %cst_11 {dimension_numbers = #tpu.dot_dimension_numbers<[1], [0], [0], [1], [0, 0, 1, 1], [], []>} : vector<32x32xf32>, vector<32x512xf32>, vector<32x512xf32> -> vector<32x512xf32>
    %14 = vector.broadcast %12 : vector<32x1xf32> to vector<32x512xf32>
    %15 = arith.addf %13, %14 : vector<32x512xf32>
    %cst_12 = arith.constant 0.000000e+00 : f32
    %16 = vector.broadcast %cst_12 : f32 to vector<32x512xf32>
    %17 = arith.cmpf oge, %15, %16 : vector<32x512xf32>
    %cst_13 = arith.constant 0.00999999977 : f32
    %18 = vector.broadcast %cst_13 : f32 to vector<32x512xf32>
    %19 = arith.mulf %18, %15 : vector<32x512xf32>
    %20 = arith.select %17, %15, %19 : vector<32x512xi1>, vector<32x512xf32>
    %c0_14 = arith.constant 0 : index
    %c0_15 = arith.constant 0 : index
    %21 = vector.load %arg6[%c0_14, %c0_15] : memref<32x32xf32, #tpu.memory_space<vmem>>, vector<32x32xf32>
    %c0_16 = arith.constant 0 : index
    %c0_17 = arith.constant 0 : index
    %22 = vector.load %arg7[%c0_16, %c0_17] : memref<32x1xf32, #tpu.memory_space<vmem>>, vector<32x1xf32>
    %cst_18 = arith.constant dense<0.000000e+00> : vector<32x512xf32>
    %23 = tpu.matmul %21, %20, %cst_18 {dimension_numbers = #tpu.dot_dimension_numbers<[1], [0], [0], [1], [0, 0, 1, 1], [], []>} : vector<32x32xf32>, vector<32x512xf32>, vector<32x512xf32> -> vector<32x512xf32>
    %24 = vector.broadcast %22 : vector<32x1xf32> to vector<32x512xf32>
    %25 = arith.addf %23, %24 : vector<32x512xf32>
    %cst_19 = arith.constant 0.000000e+00 : f32
    %26 = vector.broadcast %cst_19 : f32 to vector<32x512xf32>
    %27 = arith.cmpf oge, %25, %26 : vector<32x512xf32>
    %cst_20 = arith.constant 0.00999999977 : f32
    %28 = vector.broadcast %cst_20 : f32 to vector<32x512xf32>
    %29 = arith.mulf %28, %25 : vector<32x512xf32>
    %30 = arith.select %27, %25, %29 : vector<32x512xi1>, vector<32x512xf32>
    %c0_21 = arith.constant 0 : index
    %c0_22 = arith.constant 0 : index
    %31 = vector.load %arg8[%c0_21, %c0_22] : memref<1x32xf32, #tpu.memory_space<vmem>>, vector<1x32xf32>
    %c0_23 = arith.constant 0 : index
    %c0_24 = arith.constant 0 : index
    %32 = vector.load %arg9[%c0_23, %c0_24] : memref<1x1xf32, #tpu.memory_space<vmem>>, vector<1x1xf32>
    %cst_25 = arith.constant dense<0.000000e+00> : vector<1x512xf32>
    %33 = tpu.matmul %31, %30, %cst_25 {dimension_numbers = #tpu.dot_dimension_numbers<[1], [0], [0], [1], [0, 0, 1, 1], [], []>} : vector<1x32xf32>, vector<32x512xf32>, vector<1x512xf32> -> vector<1x512xf32>
    %34 = vector.broadcast %32 : vector<1x1xf32> to vector<1x512xf32>
    %35 = arith.addf %33, %34 : vector<1x512xf32>
    %36 = arith.subf %35, %35 : vector<1x512xf32>
    %c0_26 = arith.constant 0 : index
    %c0_27 = arith.constant 0 : index
    %37 = vector.load %arg10[%c0_26, %c0_27] : memref<1x512xf32, #tpu.memory_space<vmem>>, vector<1x512xf32>
    tpu.vector_store %arg10[%c0_26, %c0_27], %36 {strides = array<i32>} : memref<1x512xf32, #tpu.memory_space<vmem>>, vector<1x512xf32>,
    return
  }
  func.func @transform_0(%arg0: i32) -> (i32, i32) {
    %c0_i32 = arith.constant 0 : i32
    %c0_i32_0 = arith.constant 0 : i32
    return %c0_i32, %arg0 : i32, i32
  }
  func.func @transform_1(%arg0: i32) -> (i32, i32) {
    %c0_i32 = arith.constant 0 : i32
    %c0_i32_0 = arith.constant 0 : i32
    %c0_i32_1 = arith.constant 0 : i32
    return %c0_i32, %c0_i32_0 : i32, i32
  }
  func.func @transform_2(%arg0: i32) -> (i32, i32) {
    %c0_i32 = arith.constant 0 : i32
    %c0_i32_0 = arith.constant 0 : i32
    %c0_i32_1 = arith.constant 0 : i32
    return %c0_i32, %c0_i32_0 : i32, i32
  }
  func.func @transform_3(%arg0: i32) -> (i32, i32) {
    %c0_i32 = arith.constant 0 : i32
    %c0_i32_0 = arith.constant 0 : i32
    %c0_i32_1 = arith.constant 0 : i32
    return %c0_i32, %c0_i32_0 : i32, i32
  }
  func.func @transform_4(%arg0: i32) -> (i32, i32) {
    %c0_i32 = arith.constant 0 : i32
    %c0_i32_0 = arith.constant 0 : i32
    %c0_i32_1 = arith.constant 0 : i32
    return %c0_i32, %c0_i32_0 : i32, i32
  }
  func.func @transform_5(%arg0: i32) -> (i32, i32) {
    %c0_i32 = arith.constant 0 : i32
    %c0_i32_0 = arith.constant 0 : i32
    %c0_i32_1 = arith.constant 0 : i32
    return %c0_i32, %c0_i32_0 : i32, i32
  }
  func.func @transform_6(%arg0: i32) -> (i32, i32) {
    %c0_i32 = arith.constant 0 : i32
    %c0_i32_0 = arith.constant 0 : i32
    %c0_i32_1 = arith.constant 0 : i32
    return %c0_i32, %c0_i32_0 : i32, i32
  }
  func.func @transform_7(%arg0: i32) -> (i32, i32) {
    %c0_i32 = arith.constant 0 : i32
    %c0_i32_0 = arith.constant 0 : i32
    %c0_i32_1 = arith.constant 0 : i32
    return %c0_i32, %c0_i32_0 : i32, i32
  }
  func.func @transform_8(%arg0: i32) -> (i32, i32) {
    %c0_i32 = arith.constant 0 : i32
    %c0_i32_0 = arith.constant 0 : i32
    %c0_i32_1 = arith.constant 0 : i32
    return %c0_i32, %c0_i32_0 : i32, i32
  }
  func.func @transform_9(%arg0: i32) -> (i32, i32) {
    %c0_i32 = arith.constant 0 : i32
    %c0_i32_0 = arith.constant 0 : i32
    return %c0_i32, %arg0 : i32, i32
  }
}

</mosaic_0001>

<bundles_post_ra>
// kernel: tpu_custom_call.1
= control target key start
LH: loop header
LB: loop body
LE: loop exit
PB: predicated region body
PF: predicated region fallthrough
CT: control target
= control target key end

     0   :  { %s1930_s0 = inlined_call_operand.vmem [shape: f32[3,1024], index: 0, kind: input, shape index: {}]   ;;  %s1931_s1 = inlined_call_operand.vmem [shape: f32[32,3], index: 1, kind: input, shape index: {}]   ;;  %s1932_s2 = inlined_call_operand.vmem [shape: f32[32,1], index: 2, kind: input, shape index: {}]   ;;  %s1933_s3 = inlined_call_operand.vmem [shape: f32[32,32], index: 3, kind: input, shape index: {}]   ;;  %s1934_s4 = inlined_call_operand.vmem [shape: f32[32,1], index: 4, kind: input, shape index: {}]   ;;  %s1935_s5 = inlined_call_operand.vmem [shape: f32[32,32], index: 5, kind: input, shape index: {}]   ;;  %s1936_s6 = inlined_call_operand.vmem [shape: f32[32,1], index: 6, kind: input, shape index: {}]   ;;  %s1937_s7 = inlined_call_operand.vmem [shape: f32[1,32], index: 7, kind: input, shape index: {}]   ;;  %s1938_s8 = inlined_call_operand.<no memory space> [shape: f32[1,1], index: 8, kind: input, shape index: {}]   ;;  %s1939_s9 = inlined_call_operand.hbm [shape: f32[1,1024], index: 9, kind: output, shape index: {}]  }
   0x1   :  { %v14_v0 = vstv %s1938_s8 }
   0x2   :  { %15 = vst [vmem:[#allocation2] sm:$0x1] %v14_v0 }
   0x3   :  { %16 = vsyncpa [#allocation4], 0 }
   0x4   :  { %18 = vsyncpa [#allocation4 + $0x1], 0  ;;  %s1677_s11 = smov 0   ;;  %s1679_s12 = smov 0  }
   0x5   :  { %s1681_s13 = smov 0   ;;  %s1683_s14 = smov 0  }
   0x6 LB: > { %s1698_s8 = sadd.s32 4294967295, %s1618_s14   ;;  %s1419_s15 = sadd.s32 4294967294, %s1618_s14   ;;  %s1618_s14 = sphi %s1683_s14, %s1945_s14   ;;  %s1614_s13 = sphi %s1681_s13, %s1944_s13   ;;  %s1610_s12 = sphi %s1679_s12, %s1943_s12   ;;  %s1606_s11 = sphi %s1677_s11, %s1942_s11  }
   0x7   : > { %s1702_s16 = sadd.s32 1, %s1618_s14   ;;  %s225_s17 = sadd.s32 1, %s1614_s13 }
   0x8   : > { %s222_s18 = ssub.s32 %s1618_s14, %s1702_s16  ;;  %p235_p0 = scmp.ne.s32.totalorder %s1614_s13, %s1610_s12 }
   0x9   : > { %p223_p1 = scmp.eq.s32.totalorder %s222_s18, 0  ;;  %p236_p2 = scmp.eq.s32.totalorder %s1698_s8, 1 }
   0xa   : > { %p241_p3 = scmp.ne.s32.totalorder %s1610_s12, %s1606_s11  ;;  %p242_p4 = scmp.eq.s32.totalorder %s1419_s15, 1 }
   0xb   : > { %s1713_s19 = scalar_select %p223_p1, %s1614_s13, %s225_s17  }
   0xc   : > { %p1715_p5 = por %p236_p2, %p235_p0  ;;  %p1719_p6 = por %p242_p4, %p241_p3 }
   0xd   : > { %p1422_p7 = scmp.ge.s32.totalorder %s1618_s14, 1  ;;  %p293_p8 = scmp.lt.s32.totalorder %s1618_s14, 3 }
   0xf   : > { %p294_p9 = pnand %p1422_p7, %p293_p8 }
  0x10   : > { %s1424_s22 = sshll.u32 (!%p294_p9), %s1698_s8, 2  ;;  %v1620_v1 = vmov (!%p294_p9), 0.0   ;;  %v342_v2 = vld [vmem:[%s1932_s2] sm:$0xff] (!%p294_p9)  ;;  %v1621_v3 = vmov (!%p294_p9), 0   ;;  %v344_v4 = vld [vmem:[%s1932_s2 + $0x10] sm:$0xff] (!%p294_p9)  ;;  %v343_v5 = vld [vmem:[%s1932_s2 + $0x8] sm:$0xff] (!%p294_p9) }
  0x11   : > { %297 = sbr.rel (%p294_p9) target bundleno = 982 (0x3d6), region = 56  ;;  %p330_p10 = scmp.lt.s32.totalorder (!%p294_p9), %s1424_s22, 7  ;;  %456 = vmatprep.mubr.f32.mxu0 (!%p294_p9), %v1620_v1  ;;  %545 = vmatprep.mubr.f32.mxu1 (!%p294_p9), %v1620_v1  ;;  %v345_v6 = vld [vmem:[%s1932_s2 + $0x18] sm:$0xff] (!%p294_p9)  ;;  %vm383_vm0 = vcmask (!%p294_p9), 1042432   ;;  %v338_v11 = vld [vmem:[%s1931_s1] sm:$0xff] (!%p294_p9)  ;;  %vm370_vm1 = vcmask (!%p294_p9), 23552  }
  0x12   : > { %1552 = vset.pattern.permute.xlu0 (!%p294_p9), %v1621_v3  ;;  %1553 = vset.pattern.permute.xlu1 (!%p294_p9), %v1621_v3  ;;  %v622_v12 = vld [vmem:[%s1934_s4] sm:$0xff] (!%p294_p9)  ;;  %v623_v13 = vld [vmem:[%s1934_s4 + $0x8] sm:$0xff] (!%p294_p9)  ;;  %v624_v15 = vld [vmem:[%s1934_s4 + $0x10] sm:$0xff] (!%p294_p9)  ;;  %s326_s25 = sand.u32 (!%p294_p9), 1, %s1610_s12   ;;  %s1461_s27 = sshll.u32 (!%p294_p9), %s1698_s8, 6 }
  0x13   : > { %348 = vperm.xlu0 (!%p294_p9), %1552, %v342_v2   ;;  %358 = vperm.xlu1 (!%p294_p9), %1553, %v344_v4   ;;  %v339_v14 = vld [vmem:[%s1931_s1 + $0x8] sm:$0xff] (!%p294_p9)  ;;  %v625_v16 = vld [vmem:[%s1934_s4 + $0x18] sm:$0xff] (!%p294_p9)  ;;  %v340_v17 = vld [vmem:[%s1931_s1 + $0x10] sm:$0xff] (!%p294_p9)  ;;  %s1423_s26 = sshll.u32 (!%p294_p9), %s326_s25, 2  ;;  %s1888_s15 = scalar_lea.hbm (!%p294_p9), %s1939_s9, %s1461_s27 }
  0x14   : > { %v889_v18 = vld [vmem:[%s1936_s6] sm:$0xff] (!%p294_p9)  ;;  %v890_v19 = vld [vmem:[%s1936_s6 + $0x8] sm:$0xff] (!%p294_p9)  ;;  %v341_v20 = vld [vmem:[%s1931_s1 + $0x18] sm:$0xff] (!%p294_p9)  ;;  %s328_s28 = scalar_lea.vmem (!%p294_p9), [#allocation3], %s1423_s26  ;;  %s1346_s17 = scalar_lea.sflag (!%p294_p9), [#allocation4], %s326_s25 }
  0x15   : > { %v891_v21 = vld [vmem:[%s1936_s6 + $0x10] sm:$0xff] (!%p294_p9)  ;;  %v892_v22 = vld [vmem:[%s1936_s6 + $0x18] sm:$0xff] (!%p294_p9)  ;;  %v1152_v23 = vld [vmem:[#allocation2] sm:$0x1] (!%p294_p9)  ;;  %s1360_s29 = sshll.u32 (!%p294_p9), %s328_s28, 4  ;;  %s1623_s8 = smov (!%p294_p9), [#allocation3]   ;;  %s1890_s29 = int_to_ptr.vmem [resolvable:$true] %s1360_s29 }
  0x16   : > { %s1560_s23 = sshll.u32 (!%p294_p9), %s1623_s8, 4  ;;  %s1561_s23 = int_to_ptr.vmem [resolvable:$false] %s1560_s23 }
  0x17   : > { %353 = vperm.xlu0 (!%p294_p9), %1552, %v343_v5   ;;  %363 = vperm.xlu1 (!%p294_p9), %1553, %v345_v6   ;;  %s1562_s24 = scalar_lea.vmem (!%p294_p9), %s1561_s23, 128  ;;  %p1563_p0 = scmp.lt.s32.totalorder (!%p294_p9), %s1890_s29, %s1561_s23 }
  0x18   : > { %s1947_s22 = smov (!%p330_p10, %s1424_s22), 7 }
  0x19   : > { %s1425_s10 = sshll.u32 %s1947_s22, 2 }
  0x1a   : > { %s333_s18 = scalar_lea.vmem %s1930_s0, %s1425_s10 }
  0x1b   : > { %v336_v7 = vld [vmem:[%s333_s18] sm:$0x77]  ;;  %v337_v8 = vld [vmem:[%s333_s18 + $0x8] sm:$0x77]  ;;  %628 = vperm.xlu0 %1552, %v622_v12   ;;  %633 = vperm.xlu1 %1553, %v623_v13   ;;  %s1556_s18 = scalar_lea.vmem %s1890_s29, 64 }
  0x1c   : > { %v368_v9 = vcombine.high %v336_v7, %v336_v7  ;;  %v369_v10 = vcombine.high %v337_v8, %v337_v8  ;;  %p1557_p11 = scmp.ne.s32.totalorder %s1890_s29, %s1556_s18  ;;  %p1564_p1 = scmp.lt.s32.totalorder %s1562_s24, %s1556_s18 }
  0x1e   : > { %1426 = vmatprep.subr.msk.mxu0 %vm383_vm0, %v368_v9  ;;  %1432 = vmatprep.subr.msk.mxu1 %vm383_vm0, %v369_v10  ;;  %p1558_p12 = pnand %p1557_p11, %p1715_p5  ;;  %p1565_p2 = por %p1564_p1, %p1563_p0 }
  0x1f   : > { %1427 = vmatpush1.msk.msra.mxu0 %vm383_vm0, %v336_v7  ;;  %1433 = vmatpush1.msk.msra.mxu1 %vm383_vm0, %v337_v8 }
  0x20   : > { %1428 = vmatmul.mubr.msk.f32.vlgmr.msra.gmra.mrb[0].mxu0 %vm370_vm1, %v338_v11  ;;  %1434 = vmatmul.mubr.msk.f32.vlgmr.msra.gmra.mrb[0].mxu1 %vm370_vm1, %v338_v11  ;;  %p1559_p13 = pneg %p1558_p12 }
  0x21   : > { %462 = vmatprep.mubr.f32.mxu0 %v1620_v1  ;;  %551 = vmatprep.mubr.f32.mxu1 %v1620_v1 }
  0x22   : > { %638 = vperm.xlu0 %1552, %v624_v15   ;;  %643 = vperm.xlu1 %1553, %v625_v16   ;;  %p1566_p3 = pnand %p1565_p2, %p1559_p13 }
  0x24   : > { %1429 = vmatmul.mubr.msk.f32.gmra.mrb[2].mxu0 %vm370_vm1, %v339_v14  ;;  %1435 = vmatmul.mubr.msk.f32.gmra.mrb[2].mxu1 %vm370_vm1, %v339_v14 }
  0x25   : > { %468 = vmatprep.mubr.f32.mxu0 %v1620_v1  ;;  %557 = vmatprep.mubr.f32.mxu1 %v1620_v1 }
  0x26   : > { %895 = vperm.xlu0 %1552, %v889_v18   ;;  %900 = vperm.xlu1 %1553, %v890_v19  }
  0x28   : > { %1430 = vmatmul.mubr.msk.f32.gmra.mrb[4].mxu0 %vm370_vm1, %v340_v17  ;;  %1436 = vmatmul.mubr.msk.f32.gmra.mrb[4].mxu1 %vm370_vm1, %v340_v17 }
  0x29   : > { %474 = vmatprep.mubr.f32.mxu0 %v1620_v1  ;;  %563 = vmatprep.mubr.f32.mxu1 %v1620_v1 }
  0x2a   : > { %905 = vperm.xlu0 %1552, %v891_v21   ;;  %910 = vperm.xlu1 %1553, %v892_v22  }
  0x2c   : > { %1431 = vmatmul.mubr.msk.f32.gmra.mrb[6].mxu0 %vm370_vm1, %v341_v20  ;;  %1437 = vmatmul.mubr.msk.f32.gmra.mrb[6].mxu1 %vm370_vm1, %v341_v20 }
  0x2d   : > { %723 = vmatprep.mubr.f32.mxu0 %v1620_v1  ;;  %812 = vmatprep.mubr.f32.mxu1 %v1620_v1 }
  0x2e   : > { %1155 = vperm.xlu0 %1552, %v1152_v23  }
  0x92   : > { %v349_v24 = vpop.permute.xlu0 %348  ;;  %v359_v47 = vpop.permute.xlu1 %358 }
  0x96   : > { %v354_v34 = vpop.permute.xlu0 %353  ;;  %v364_v9 = vpop.permute.xlu1 %363 }
  0xf3   : > { %v458_v25 = vpop.f32.mrb[0].mxu0  ;;  %v547_v26 = vpop.f32.mrb[0].mxu1 }
  0xf4   : > { %v459_v27 = vadd.f32 %v458_v25, %v349_v24  ;;  %v548_v28 = vadd.f32 %v547_v26, %v349_v24  ;;  %v460_v29 = vpop.f32.mrb[1].mxu0  ;;  %v549_v30 = vpop.f32.mrb[1].mxu1 }
  0xf5   : > { %v461_v31 = vadd.f32 %v460_v29, %v349_v24  ;;  %v550_v32 = vadd.f32 %v549_v30, %v349_v24 }
  0xf6   : > { %v586_v33 = vmul.f32 0.01, %v459_v27  ;;  %vm570_vm2 = vcmp.ge.f32.partialorder %v459_v27, 0.0  ;;  %vm572_vm3 = vcmp.ge.f32.partialorder %v548_v28, 0.0  ;;  %v588_v35 = vmul.f32 0.01, %v548_v28 }
  0xf7   : > { %vm571_vm4 = vcmp.ge.f32.partialorder %v461_v31, 0.0  ;;  %v464_v36 = vpop.f32.mrb[2].mxu0  ;;  %v553_v37 = vpop.f32.mrb[2].mxu1  ;;  %v587_v38 = vmul.f32 0.01, %v461_v31  ;;  %vm573_vm5 = vcmp.ge.f32.partialorder %v550_v32, 0.0 }
  0xf8   : > { %v465_v39 = vadd.f32 %v464_v36, %v354_v34  ;;  %v554_v40 = vadd.f32 %v553_v37, %v354_v34  ;;  %v466_v41 = vpop.f32.mrb[3].mxu0  ;;  %v555_v42 = vpop.f32.mrb[3].mxu1  ;;  %v1795_v43 = vsel %vm570_vm2, %v459_v27, %v586_v33  ;;  %v589_v44 = vmul.f32 0.01, %v550_v32  ;;  %v618_v37 = vld [vmem:[%s1933_s3] sm:$0xff] }
  0xf9   : > { %v467_v45 = vadd.f32 %v466_v41, %v354_v34  ;;  %v556_v46 = vadd.f32 %v555_v42, %v354_v34  ;;  %v604_v50 = vsel %vm572_vm3, %v548_v28, %v588_v35  ;;  %v603_v57 = vsel %vm571_vm4, %v461_v31, %v587_v38  ;;  %v619_v38 = vld [vmem:[%s1933_s3 + $0x8] sm:$0xff]  ;;  %v629_v41 = vpop.permute.xlu0 %628 }
  0xfa   : > { %vm574_vm6 = vcmp.ge.f32.partialorder %v465_v39, 0.0  ;;  %v590_v48 = vmul.f32 0.01, %v465_v39  ;;  %vm576_vm7 = vcmp.ge.f32.partialorder %v554_v40, 0.0  ;;  %v592_v49 = vmul.f32 0.01, %v554_v40 }
  0xfb   : > { %vm575_vm8 = vcmp.ge.f32.partialorder %v467_v45, 0.0  ;;  %v591_v51 = vmul.f32 0.01, %v467_v45  ;;  %v593_v52 = vmul.f32 0.01, %v556_v46  ;;  %vm577_vm9 = vcmp.ge.f32.partialorder %v556_v46, 0.0 }
  0xfc   : > { %v606_v53 = vsel %vm574_vm6, %v465_v39, %v590_v48  ;;  %v608_v54 = vsel %vm576_vm7, %v554_v40, %v592_v49  ;;  %v470_v55 = vpop.f32.mrb[4].mxu0  ;;  %v559_v56 = vpop.f32.mrb[4].mxu1  ;;  %v605_v6 = vsel %vm573_vm5, %v550_v32, %v589_v44  ;;  %vm646_vm2 = vcmask 261120   ;;  %v620_v39 = vld [vmem:[%s1933_s3 + $0x10] sm:$0xff]  ;;  %v621_v40 = vld [vmem:[%s1933_s3 + $0x18] sm:$0xff] }
  0xfd   : > { %v1464_v58 = vpack.c.bf16 %v606_v53, %v1795_v43  ;;  %v1472_v59 = vpack.c.bf16 %v608_v54, %v604_v50  ;;  %v471_v60 = vadd.f32 %v470_v55, %v359_v47  ;;  %v560_v61 = vadd.f32 %v559_v56, %v359_v47  ;;  %v472_v62 = vpop.f32.mrb[5].mxu0  ;;  %v561_v63 = vpop.f32.mrb[5].mxu1 }
  0xfe   : > { %v473_v0 = vadd.f32 %v472_v62, %v359_v47  ;;  %v562_v2 = vadd.f32 %v561_v63, %v359_v47  ;;  %v607_v5 = vsel %vm575_vm8, %v467_v45, %v591_v51  ;;  %v609_v8 = vsel %vm577_vm9, %v556_v46, %v593_v52  ;;  %v634_v51 = vpop.permute.xlu1 %633 }
  0xff   : > { %v476_v3 = vpop.f32.mrb[6].mxu0  ;;  %v565_v4 = vpop.f32.mrb[6].mxu1  ;;  %vm578_vm10 = vcmp.ge.f32.partialorder %v471_v60, 0.0  ;;  %v594_v7 = vmul.f32 0.01, %v471_v60  ;;  %vm580_vm11 = vcmp.ge.f32.partialorder %v560_v61, 0.0  ;;  %v1462_v20 = vpack.c.bf16 %v607_v5, %v603_v57 }
 0x100   : > { %v596_v10 = vmul.f32 0.01, %v560_v61  ;;  %vm579_vm12 = vcmp.ge.f32.partialorder %v473_v0, 0.0  ;;  %v595_v11 = vmul.f32 0.01, %v473_v0  ;;  %vm581_vm13 = vcmp.ge.f32.partialorder %v562_v2, 0.0 }
 0x101   : > { %v610_v12 = vsel %vm578_vm10, %v471_v60, %v594_v7  ;;  %v597_v13 = vmul.f32 0.01, %v562_v2  ;;  %v477_v14 = vadd.f32 %v476_v3, %v364_v9  ;;  %v566_v15 = vadd.f32 %v565_v4, %v364_v9  ;;  %v478_v16 = vpop.f32.mrb[7].mxu0  ;;  %v567_v17 = vpop.f32.mrb[7].mxu1  ;;  %1463 = vmatprep.subr.bf16.mxu0 %v1462_v20 }
 0x102   : > { %v479_v18 = vadd.f32 %v478_v16, %v364_v9  ;;  %v568_v19 = vadd.f32 %v567_v17, %v364_v9  ;;  %v1470_v21 = vpack.c.bf16 %v609_v8, %v605_v6  ;;  %v612_v26 = vsel %vm580_vm11, %v560_v61, %v596_v10  ;;  %1465 = vmatpush1.bf16.msra.mxu0 %v1464_v58  ;;  %v639_v3 = vpop.permute.xlu0 %638 }
 0x103   : > { %vm582_vm14 = vcmp.ge.f32.partialorder %v477_v14, 0.0  ;;  %v598_v22 = vmul.f32 0.01, %v477_v14  ;;  %vm584_vm15 = vcmp.ge.f32.partialorder %v566_v15, 0.0  ;;  %v600_v23 = vmul.f32 0.01, %v566_v15 }
 0x104   : > { %vm583_vm0 = vcmp.ge.f32.partialorder %v479_v18, 0.0  ;;  %v599_v24 = vmul.f32 0.01, %v479_v18  ;;  %vm585_vm1 = vcmp.ge.f32.partialorder %v568_v19, 0.0  ;;  %v601_v25 = vmul.f32 0.01, %v568_v19  ;;  %1471 = vmatprep.subr.bf16.mxu1 %v1470_v21 }
 0x105   : > { %v614_v27 = vsel %vm582_vm14, %v477_v14, %v598_v22  ;;  %v616_v28 = vsel %vm584_vm15, %v566_v15, %v600_v23  ;;  %1473 = vmatpush1.bf16.msra.mxu1 %v1472_v59  ;;  %v611_v31 = vsel %vm579_vm12, %v473_v0, %v595_v11  ;;  %v613_v34 = vsel %vm581_vm13, %v562_v2, %v597_v13 }
 0x106   : > { %v1468_v29 = vpack.c.bf16 %v614_v27, %v610_v12  ;;  %v1476_v30 = vpack.c.bf16 %v616_v28, %v612_v26  ;;  %v615_v32 = vsel %vm583_vm0, %v479_v18, %v599_v24  ;;  %v617_v35 = vsel %vm585_vm1, %v568_v19, %v601_v25  ;;  %v644_v25 = vpop.permute.xlu1 %643 }
 0x107   : > { %v1466_v33 = vpack.c.bf16 %v615_v32, %v611_v31  ;;  %v1474_v36 = vpack.c.bf16 %v617_v35, %v613_v34 }
 0x109   : > { %1467 = vmatprep.subr.bf16.mxu0 %v1466_v33  ;;  %1475 = vmatprep.subr.bf16.mxu1 %v1474_v36 }
 0x10a   : > { %1469 = vmatpush1.bf16.msra.mxu0 %v1468_v29  ;;  %1477 = vmatpush1.bf16.msra.mxu1 %v1476_v30 }
 0x10d   : > { %1438 = vmatmul.mubr.msk.f32.vlgmr.msra.gmra.mrb[8].mxu0 %vm646_vm2, %v618_v37  ;;  %1442 = vmatmul.mubr.msk.f32.vlgmr.msra.gmra.mrb[8].mxu1 %vm646_vm2, %v618_v37 }
 0x10e   : > { %729 = vmatprep.mubr.f32.mxu0 %v1620_v1  ;;  %818 = vmatprep.mubr.f32.mxu1 %v1620_v1 }
 0x111   : > { %1439 = vmatmul.mubr.msk.f32.gmra.mrb[10].mxu0 %vm646_vm2, %v619_v38  ;;  %1443 = vmatmul.mubr.msk.f32.gmra.mrb[10].mxu1 %vm646_vm2, %v619_v38 }
 0x112   : > { %735 = vmatprep.mubr.f32.mxu0 %v1620_v1  ;;  %824 = vmatprep.mubr.f32.mxu1 %v1620_v1 }
 0x115   : > { %1440 = vmatmul.mubr.msk.f32.gmra.mrb[12].mxu0 %vm646_vm2, %v620_v39  ;;  %1444 = vmatmul.mubr.msk.f32.gmra.mrb[12].mxu1 %vm646_vm2, %v620_v39 }
 0x116   : > { %741 = vmatprep.mubr.f32.mxu0 %v1620_v1  ;;  %830 = vmatprep.mubr.f32.mxu1 %v1620_v1 }
 0x119   : > { %1441 = vmatmul.mubr.msk.f32.gmra.mrb[14].mxu0 %vm646_vm2, %v621_v40  ;;  %1445 = vmatmul.mubr.msk.f32.gmra.mrb[14].mxu1 %vm646_vm2, %v621_v40 }
 0x11a   : > { %989 = vmatprep.mubr.f32.mxu0 %v1620_v1  ;;  %1078 = vmatprep.mubr.f32.mxu1 %v1620_v1 }
 0x1e0   : > { %v725_v42 = vpop.f32.mrb[8].mxu0  ;;  %v814_v44 = vpop.f32.mrb[8].mxu1 }
 0x1e1   : > { %v726_v43 = vadd.f32 %v725_v42, %v629_v41  ;;  %v727_v45 = vpop.f32.mrb[9].mxu0  ;;  %v815_v46 = vadd.f32 %v814_v44, %v629_v41  ;;  %v816_v48 = vpop.f32.mrb[9].mxu1 }
 0x1e2   : > { %v728_v47 = vadd.f32 %v727_v45, %v629_v41  ;;  %v817_v50 = vadd.f32 %v816_v48, %v629_v41 }
 0x1e3   : > { %v853_v49 = vmul.f32 0.01, %v726_v43  ;;  %vm837_vm3 = vcmp.ge.f32.partialorder %v726_v43, 0.0  ;;  %vm839_vm4 = vcmp.ge.f32.partialorder %v815_v46, 0.0  ;;  %v855_v52 = vmul.f32 0.01, %v815_v46 }
 0x1e4   : > { %v731_v53 = vpop.f32.mrb[10].mxu0  ;;  %v820_v54 = vpop.f32.mrb[10].mxu1  ;;  %vm838_vm5 = vcmp.ge.f32.partialorder %v728_v47, 0.0  ;;  %v854_v55 = vmul.f32 0.01, %v728_v47  ;;  %vm840_vm8 = vcmp.ge.f32.partialorder %v817_v50, 0.0 }
 0x1e5   : > { %v732_v56 = vadd.f32 %v731_v53, %v634_v51  ;;  %v821_v57 = vadd.f32 %v820_v54, %v634_v51  ;;  %v733_v58 = vpop.f32.mrb[11].mxu0  ;;  %v822_v59 = vpop.f32.mrb[11].mxu1  ;;  %v869_v60 = vsel %vm837_vm3, %v726_v43, %v853_v49  ;;  %v856_v61 = vmul.f32 0.01, %v817_v50  ;;  %v885_v54 = vld [vmem:[%s1935_s5] sm:$0xff] }
 0x1e6   : > { %v734_v62 = vadd.f32 %v733_v58, %v634_v51  ;;  %v823_v63 = vadd.f32 %v822_v59, %v634_v51  ;;  %v871_v6 = vsel %vm839_vm4, %v815_v46, %v855_v52  ;;  %v870_v22 = vsel %vm838_vm5, %v728_v47, %v854_v55  ;;  %v886_v55 = vld [vmem:[%s1935_s5 + $0x8] sm:$0xff]  ;;  %v896_v58 = vpop.permute.xlu0 %895 }
 0x1e7   : > { %vm841_vm6 = vcmp.ge.f32.partialorder %v732_v56, 0.0  ;;  %v857_v0 = vmul.f32 0.01, %v732_v56  ;;  %vm843_vm7 = vcmp.ge.f32.partialorder %v821_v57, 0.0  ;;  %v859_v2 = vmul.f32 0.01, %v821_v57 }
 0x1e8   : > { %vm842_vm9 = vcmp.ge.f32.partialorder %v734_v62, 0.0  ;;  %v858_v4 = vmul.f32 0.01, %v734_v62  ;;  %v860_v5 = vmul.f32 0.01, %v823_v63  ;;  %vm844_vm10 = vcmp.ge.f32.partialorder %v823_v63, 0.0 }
 0x1e9   : > { %v873_v7 = vsel %vm841_vm6, %v732_v56, %v857_v0  ;;  %v875_v8 = vsel %vm843_vm7, %v821_v57, %v859_v2  ;;  %v737_v9 = vpop.f32.mrb[12].mxu0  ;;  %v826_v10 = vpop.f32.mrb[12].mxu1  ;;  %v872_v23 = vsel %vm840_vm8, %v817_v50, %v856_v61  ;;  %v887_v56 = vld [vmem:[%s1935_s5 + $0x10] sm:$0xff]  ;;  %v888_v57 = vld [vmem:[%s1935_s5 + $0x18] sm:$0xff] }
 0x1ea   : > { %v1480_v11 = vpack.c.bf16 %v873_v7, %v869_v60  ;;  %v1488_v12 = vpack.c.bf16 %v875_v8, %v871_v6  ;;  %v738_v13 = vadd.f32 %v737_v9, %v639_v3  ;;  %v827_v14 = vadd.f32 %v826_v10, %v639_v3  ;;  %v739_v15 = vpop.f32.mrb[13].mxu0  ;;  %v828_v16 = vpop.f32.mrb[13].mxu1 }
 0x1eb   : > { %v740_v17 = vadd.f32 %v739_v15, %v639_v3  ;;  %v829_v18 = vadd.f32 %v828_v16, %v639_v3  ;;  %v874_v20 = vsel %vm842_vm9, %v734_v62, %v858_v4  ;;  %v876_v24 = vsel %vm844_vm10, %v823_v63, %v860_v5  ;;  %v901_v5 = vpop.permute.xlu1 %900 }
 0x1ec   : > { %v743_v19 = vpop.f32.mrb[14].mxu0  ;;  %v861_v21 = vmul.f32 0.01, %v738_v13  ;;  %vm845_vm11 = vcmp.ge.f32.partialorder %v738_v13, 0.0  ;;  %vm847_vm12 = vcmp.ge.f32.partialorder %v827_v14, 0.0  ;;  %v832_v29 = vpop.f32.mrb[14].mxu1  ;;  %v1478_v31 = vpack.c.bf16 %v874_v20, %v870_v22 }
 0x1ed   : > { %v863_v26 = vmul.f32 0.01, %v827_v14  ;;  %vm846_vm13 = vcmp.ge.f32.partialorder %v740_v17, 0.0  ;;  %v862_v27 = vmul.f32 0.01, %v740_v17  ;;  %vm848_vm14 = vcmp.ge.f32.partialorder %v829_v18, 0.0 }
 0x1ee   : > { %v744_v28 = vadd.f32 %v743_v19, %v644_v25  ;;  %v745_v30 = vpop.f32.mrb[15].mxu0  ;;  %v864_v32 = vmul.f32 0.01, %v829_v18  ;;  %v833_v33 = vadd.f32 %v832_v29, %v644_v25  ;;  %v834_v35 = vpop.f32.mrb[15].mxu1  ;;  %v1486_v36 = vpack.c.bf16 %v876_v24, %v872_v23  ;;  %1479 = vmatprep.subr.bf16.mxu0 %v1478_v31 }
 0x1ef   : > { %v746_v34 = vadd.f32 %v745_v30, %v644_v25  ;;  %v877_v37 = vsel %vm845_vm11, %v738_v13, %v861_v21  ;;  %v835_v39 = vadd.f32 %v834_v35, %v644_v25  ;;  %1481 = vmatpush1.bf16.msra.mxu0 %v1480_v11  ;;  %v879_v42 = vsel %vm847_vm12, %v827_v14, %v863_v26  ;;  %v906_v19 = vpop.permute.xlu0 %905 }
 0x1f0   : > { %vm849_vm15 = vcmp.ge.f32.partialorder %v744_v28, 0.0  ;;  %v865_v38 = vmul.f32 0.01, %v744_v28  ;;  %vm851_vm0 = vcmp.ge.f32.partialorder %v833_v33, 0.0  ;;  %v867_v40 = vmul.f32 0.01, %v833_v33  ;;  %1487 = vmatprep.subr.bf16.mxu1 %v1486_v36 }
 0x1f1   : > { %vm850_vm1 = vcmp.ge.f32.partialorder %v746_v34, 0.0  ;;  %v866_v41 = vmul.f32 0.01, %v746_v34  ;;  %vm852_vm3 = vcmp.ge.f32.partialorder %v835_v39, 0.0  ;;  %v868_v44 = vmul.f32 0.01, %v835_v39  ;;  %1489 = vmatpush1.bf16.msra.mxu1 %v1488_v12 }
 0x1f2   : > { %v881_v43 = vsel %vm849_vm15, %v744_v28, %v865_v38  ;;  %v883_v46 = vsel %vm851_vm0, %v833_v33, %v867_v40  ;;  %v878_v47 = vsel %vm846_vm13, %v740_v17, %v862_v27  ;;  %v880_v51 = vsel %vm848_vm14, %v829_v18, %v864_v32 }
 0x1f3   : > { %v1484_v45 = vpack.c.bf16 %v881_v43, %v877_v37  ;;  %v882_v48 = vsel %vm850_vm1, %v746_v34, %v866_v41  ;;  %v1492_v49 = vpack.c.bf16 %v883_v46, %v879_v42  ;;  %v884_v52 = vsel %vm852_vm3, %v835_v39, %v868_v44  ;;  %v911_v41 = vpop.permute.xlu1 %910 }
 0x1f4   : > { %v1482_v50 = vpack.c.bf16 %v882_v48, %v878_v47  ;;  %v1490_v53 = vpack.c.bf16 %v884_v52, %v880_v51 }
 0x1f6   : > { %1483 = vmatprep.subr.bf16.mxu0 %v1482_v50  ;;  %1491 = vmatprep.subr.bf16.mxu1 %v1490_v53 }
 0x1f7   : > { %1485 = vmatpush1.bf16.msra.mxu0 %v1484_v45  ;;  %1493 = vmatpush1.bf16.msra.mxu1 %v1492_v49 }
 0x1fa   : > { %1446 = vmatmul.mubr.msk.f32.vlgmr.msra.gmra.mrb[16].mxu0 %vm646_vm2, %v885_v54  ;;  %1450 = vmatmul.mubr.msk.f32.vlgmr.msra.gmra.mrb[16].mxu1 %vm646_vm2, %v885_v54 }
 0x1fb   : > { %995 = vmatprep.mubr.f32.mxu0 %v1620_v1  ;;  %1084 = vmatprep.mubr.f32.mxu1 %v1620_v1 }
 0x1fe   : > { %1447 = vmatmul.mubr.msk.f32.gmra.mrb[18].mxu0 %vm646_vm2, %v886_v55  ;;  %1451 = vmatmul.mubr.msk.f32.gmra.mrb[18].mxu1 %vm646_vm2, %v886_v55 }
 0x1ff   : > { %1001 = vmatprep.mubr.f32.mxu0 %v1620_v1  ;;  %1090 = vmatprep.mubr.f32.mxu1 %v1620_v1 }
 0x202   : > { %1448 = vmatmul.mubr.msk.f32.gmra.mrb[20].mxu0 %vm646_vm2, %v887_v56  ;;  %1452 = vmatmul.mubr.msk.f32.gmra.mrb[20].mxu1 %vm646_vm2, %v887_v56 }
 0x203   : > { %1007 = vmatprep.mubr.f32.mxu0 %v1620_v1  ;;  %1096 = vmatprep.mubr.f32.mxu1 %v1620_v1 }
 0x206   : > { %1449 = vmatmul.mubr.msk.f32.gmra.mrb[22].mxu0 %vm646_vm2, %v888_v57  ;;  %1453 = vmatmul.mubr.msk.f32.gmra.mrb[22].mxu1 %vm646_vm2, %v888_v57 }
 0x207   : > { %1229 = vmatprep.mubr.f32.mxu0 %v1620_v1  ;;  %1300 = vmatprep.mubr.f32.mxu1 %v1620_v1 }
 0x2cd   : > { %v991_v59 = vpop.f32.mrb[16].mxu0  ;;  %v1080_v61 = vpop.f32.mrb[16].mxu1 }
 0x2ce   : > { %v992_v60 = vadd.f32 %v991_v59, %v896_v58  ;;  %v993_v62 = vpop.f32.mrb[17].mxu0  ;;  %v1081_v63 = vadd.f32 %v1080_v61, %v896_v58  ;;  %v1082_v2 = vpop.f32.mrb[17].mxu1 }
 0x2cf   : > { %v994_v0 = vadd.f32 %v993_v62, %v896_v58  ;;  %v1083_v4 = vadd.f32 %v1082_v2, %v896_v58 }
 0x2d0   : > { %v1119_v3 = vmul.f32 0.01, %v992_v60  ;;  %vm1103_vm4 = vcmp.ge.f32.partialorder %v992_v60, 0.0  ;;  %vm1105_vm5 = vcmp.ge.f32.partialorder %v1081_v63, 0.0  ;;  %v1121_v6 = vmul.f32 0.01, %v1081_v63 }
 0x2d1   : > { %v997_v7 = vpop.f32.mrb[18].mxu0  ;;  %v1086_v8 = vpop.f32.mrb[18].mxu1  ;;  %vm1104_vm6 = vcmp.ge.f32.partialorder %v994_v0, 0.0  ;;  %v1120_v9 = vmul.f32 0.01, %v994_v0  ;;  %vm1106_vm9 = vcmp.ge.f32.partialorder %v1083_v4, 0.0 }
 0x2d2   : > { %v998_v10 = vadd.f32 %v997_v7, %v901_v5  ;;  %v1087_v1 = vadd.f32 %v1086_v8, %v901_v5  ;;  %v999_v11 = vpop.f32.mrb[19].mxu0  ;;  %v1088_v12 = vpop.f32.mrb[19].mxu1  ;;  %v1135_v13 = vsel %vm1103_vm4, %v992_v60, %v1119_v3  ;;  %v1122_v14 = vmul.f32 0.01, %v1083_v4  ;;  %v1151_v7 = vld [vmem:[%s1937_s7] sm:$0x1] }
 0x2d3   : > { %v1000_v15 = vadd.f32 %v999_v11, %v901_v5  ;;  %v1089_v16 = vadd.f32 %v1088_v12, %v901_v5  ;;  %v1137_v22 = vsel %vm1105_vm5, %v1081_v63, %v1121_v6  ;;  %v1136_v38 = vsel %vm1104_vm6, %v994_v0, %v1120_v9  ;;  %v1156_v12 = vpop.permute.xlu0 %1155 }
 0x2d4   : > { %vm1107_vm7 = vcmp.ge.f32.partialorder %v998_v10, 0.0  ;;  %v1123_v17 = vmul.f32 0.01, %v998_v10  ;;  %vm1109_vm8 = vcmp.ge.f32.partialorder %v1087_v1, 0.0  ;;  %v1125_v18 = vmul.f32 0.01, %v1087_v1 }
 0x2d5   : > { %vm1108_vm10 = vcmp.ge.f32.partialorder %v1000_v15, 0.0  ;;  %v1124_v20 = vmul.f32 0.01, %v1000_v15  ;;  %v1126_v21 = vmul.f32 0.01, %v1089_v16  ;;  %vm1110_vm11 = vcmp.ge.f32.partialorder %v1089_v16, 0.0 }
 0x2d6   : > { %v1139_v23 = vsel %vm1107_vm7, %v998_v10, %v1123_v17  ;;  %v1141_v24 = vsel %vm1109_vm8, %v1087_v1, %v1125_v18  ;;  %v1003_v25 = vpop.f32.mrb[20].mxu0  ;;  %v1092_v26 = vpop.f32.mrb[20].mxu1  ;;  %v1138_v39 = vsel %vm1106_vm9, %v1083_v4, %v1122_v14  ;;  %v1158_v8 = vlaneseq }
 0x2d7   : > { %v1496_v27 = vpack.c.bf16 %v1139_v23, %v1135_v13  ;;  %v1504_v28 = vpack.c.bf16 %v1141_v24, %v1137_v22  ;;  %v1004_v29 = vadd.f32 %v1003_v25, %v906_v19  ;;  %v1093_v30 = vadd.f32 %v1092_v26, %v906_v19  ;;  %v1005_v31 = vpop.f32.mrb[21].mxu0  ;;  %v1094_v32 = vpop.f32.mrb[21].mxu1 }
 0x2d8   : > { %v1006_v33 = vadd.f32 %v1005_v31, %v906_v19  ;;  %v1095_v34 = vadd.f32 %v1094_v32, %v906_v19  ;;  %v1140_v36 = vsel %vm1108_vm10, %v1000_v15, %v1124_v20  ;;  %v1142_v40 = vsel %vm1110_vm11, %v1089_v16, %v1126_v21 }
 0x2d9   : > { %v1009_v35 = vpop.f32.mrb[22].mxu0  ;;  %v1127_v37 = vmul.f32 0.01, %v1004_v29  ;;  %vm1111_vm12 = vcmp.ge.f32.partialorder %v1004_v29, 0.0  ;;  %vm1113_vm13 = vcmp.ge.f32.partialorder %v1093_v30, 0.0  ;;  %v1098_v45 = vpop.f32.mrb[22].mxu1  ;;  %v1494_v47 = vpack.c.bf16 %v1140_v36, %v1136_v38 }
 0x2da   : > { %v1129_v42 = vmul.f32 0.01, %v1093_v30  ;;  %vm1112_vm14 = vcmp.ge.f32.partialorder %v1006_v33, 0.0  ;;  %v1128_v43 = vmul.f32 0.01, %v1006_v33  ;;  %vm1114_vm15 = vcmp.ge.f32.partialorder %v1095_v34, 0.0 }
 0x2db   : > { %v1010_v44 = vadd.f32 %v1009_v35, %v911_v41  ;;  %v1011_v46 = vpop.f32.mrb[23].mxu0  ;;  %v1130_v48 = vmul.f32 0.01, %v1095_v34  ;;  %v1099_v49 = vadd.f32 %v1098_v45, %v911_v41  ;;  %v1100_v51 = vpop.f32.mrb[23].mxu1  ;;  %v1502_v52 = vpack.c.bf16 %v1142_v40, %v1138_v39  ;;  %1495 = vmatprep.subr.bf16.mxu0 %v1494_v47 }
 0x2dc   : > { %v1012_v50 = vadd.f32 %v1011_v46, %v911_v41  ;;  %v1143_v53 = vsel %vm1111_vm12, %v1004_v29, %v1127_v37  ;;  %v1101_v55 = vadd.f32 %v1100_v51, %v911_v41  ;;  %1497 = vmatpush1.bf16.msra.mxu0 %v1496_v27  ;;  %v1145_v58 = vsel %vm1113_vm13, %v1093_v30, %v1129_v42 }
 0x2dd   : > { %vm1115_vm0 = vcmp.ge.f32.partialorder %v1010_v44, 0.0  ;;  %v1131_v54 = vmul.f32 0.01, %v1010_v44  ;;  %vm1117_vm1 = vcmp.ge.f32.partialorder %v1099_v49, 0.0  ;;  %v1133_v56 = vmul.f32 0.01, %v1099_v49  ;;  %1503 = vmatprep.subr.bf16.mxu1 %v1502_v52 }
 0x2de   : > { %vm1116_vm3 = vcmp.ge.f32.partialorder %v1012_v50, 0.0  ;;  %v1132_v57 = vmul.f32 0.01, %v1012_v50  ;;  %vm1118_vm4 = vcmp.ge.f32.partialorder %v1101_v55, 0.0  ;;  %v1134_v60 = vmul.f32 0.01, %v1101_v55  ;;  %1505 = vmatpush1.bf16.msra.mxu1 %v1504_v28 }
 0x2df   : > { %v1147_v59 = vsel %vm1115_vm0, %v1010_v44, %v1131_v54  ;;  %v1149_v62 = vsel %vm1117_vm1, %v1099_v49, %v1133_v56  ;;  %v1144_v63 = vsel %vm1112_vm14, %v1006_v33, %v1128_v43  ;;  %v1146_v4 = vsel %vm1114_vm15, %v1095_v34, %v1130_v48 }
 0x2e0   : > { %v1500_v61 = vpack.c.bf16 %v1147_v59, %v1143_v53  ;;  %v1148_v0 = vsel %vm1116_vm3, %v1012_v50, %v1132_v57  ;;  %v1508_v2 = vpack.c.bf16 %v1149_v62, %v1145_v58  ;;  %v1150_v5 = vsel %vm1118_vm4, %v1101_v55, %v1134_v60 }
 0x2e1   : > { %v1498_v3 = vpack.c.bf16 %v1148_v0, %v1144_v63  ;;  %v1506_v6 = vpack.c.bf16 %v1150_v5, %v1146_v4  ;;  %v1159_v9 = vshrl.u32 %v1158_v8, 7  ;;  %v1622_v1 = vmov 1966171168  }
 0x2e2   : > { %v1318_v11 = vunpack.c.l.s4 %v1622_v1 }
 0x2e3   : > { %1499 = vmatprep.subr.bf16.mxu0 %v1498_v3  ;;  %1507 = vmatprep.subr.bf16.mxu1 %v1506_v6  ;;  %v1160_v10 = vsub.s32 0, %v1159_v9 }
 0x2e4   : > { %1501 = vmatpush1.bf16.msra.mxu0 %v1500_v61  ;;  %1509 = vmatpush1.bf16.msra.mxu1 %v1508_v2  ;;  %v1319_v14 = vunpack.c.0.s8 %v1318_v11 }
 0x2e5   : > { %v1161_v13 = vrot.slane %v1156_v12, %v1160_v10 }
 0x2e6   : > { %v1322_v24 = vsub.s32 %v1319_v14, %v1159_v9 }
 0x2e7   : > { %1454 = vmatmul.mubr.msk.f32.vlgmr.msra.gmra.mrb[24].mxu0 %vm646_vm2, %v1151_v7  ;;  %1455 = vmatmul.mubr.msk.f32.vlgmr.msra.gmra.mrb[24].mxu1 %vm646_vm2, %v1151_v7  ;;  %vm1342_vm2 = vcmp.lt.s32.totalorder %v1158_v8, 512 }
 0x3ba   : > { %v1231_v15 = vpop.f32.mrb[24].mxu0  ;;  %v1302_v17 = vpop.f32.mrb[24].mxu1 }
 0x3bb   : > { %v1232_v16 = vadd.f32 %v1231_v15, %v1161_v13  ;;  %v1233_v18 = vpop.f32.mrb[25].mxu0  ;;  %v1303_v19 = vadd.f32 %v1302_v17, %v1161_v13  ;;  %v1304_v21 = vpop.f32.mrb[25].mxu1 }
 0x3bc   : > { %v1234_v20 = vadd.f32 %v1233_v18, %v1161_v13  ;;  %v1305_v23 = vadd.f32 %v1304_v21, %v1161_v13 }
 0x3bd   : > { %v1307_v22 = vsub.f32 %v1232_v16, %v1232_v16  ;;  %v1309_v25 = vsub.f32 %v1303_v19, %v1303_v19 }
 0x3be   : > { %v1308_v26 = vsub.f32 %v1234_v20, %v1234_v20  ;;  %v1310_v27 = vsub.f32 %v1305_v23, %v1305_v23 }
 0x3c0   : > { %v1315_v28 = vcombine.low %v1307_v22, %v1308_v26  ;;  %v1316_v29 = vcombine.low %v1309_v25, %v1310_v27 }
 0x3c2   : > { %v1323_v30 = vrot.slane %v1315_v28, %v1322_v24  ;;  %v1330_v31 = vrot.slane %v1316_v29, %v1322_v24 }
 0x3c4   : > { %v1331_v32 = vcombine.low %v1323_v30, %v1330_v31 }
 0x3c6   : > { %v1338_v33 = vrot.slane %v1331_v32, %v1322_v24 }
 0x3c8   : > { %1344 = vst.msk [vmem:[%s328_s28] sm:$0xf] %vm1342_vm2, %v1338_v33 }
 0x3c9   : > { %1569 = shalt.err (!%p1566_p3)
}
 0x3ca   : > { %s1570_s22 = scalar_lea.hbm %s1888_s15, 64  ;;  %s1574_s27 = scalar_lea.hbm %s1939_s9, 128 }
 0x3cb   : > { %p1571_p4 = scmp.ne.s32.totalorder %s1888_s15, %s1570_s22  ;;  %p1575_p9 = scmp.lt.u32.totalorder %s1888_s15, %s1939_s9 }
 0x3cc   : > { %p1576_p10 = scmp.lt.u32.totalorder %s1574_s27, %s1570_s22  ;;  %p1578_p12 = scmp.lt.u32.totalorder %s1570_s22, %s1888_s15 }
 0x3cd   : > { %p1572_p7 = pnand %p1571_p4, %p1715_p5 }
 0x3ce   : > { %p1577_p11 = por %p1576_p10, %p1575_p9 }
 0x3cf   : > { %p1573_p8 = pneg %p1572_p7 }
 0x3d0   : > { %p1579_p13 = por %p1578_p12, %p1577_p11 }
 0x3d2   : > { %p1580_p0 = pnand %p1579_p13, %p1573_p8 }
 0x3d4   : > { %1583 = shalt.err (!%p1580_p0)
}
 0x3d5   : > { %1510 = dma.vmem_to_hbm [thread:$0]  (%p1715_p5), %s1890_s29, 64, %s1888_s15, %s1346_s17  }
 0x3d6 PF: > { %p1516_p1 = scmp.ge.s32.totalorder %s1618_s14, 2  ;;  %s1372_s10 = sand.u32 1, %s1606_s11  }
 0x3d7   : > { %s1373_s18 = scalar_lea.sflag [#allocation4], %s1372_s10 }
 0x3d8   : > { %p1513_p2 = pnand %p1516_p1, %p1719_p6 }
 0x3da   : > { %1601 = dma.done.wait (!%p1513_p2), %s1373_s18, 64  }
 0x3db   : > { %1603 = vsyncadd (!%p1513_p2), %s1373_s18, 4294967232  ;;  %p21_p3 = scmp.ge.s32.totalorder %s1702_s16, 4   ;;  %s1942_s11 = smov %s1610_s12 }
 0x3dc   : > { %s1943_s12 = smov %s1614_s13  ;;  %s1944_s13 = smov %s1713_s19 }
 0x3dd   : > { %s1945_s14 = smov %s1702_s16  ;;  %23 = sbr.rel (!%p21_p3) target bundleno = 6 (0x6), region = 91 }
 0x3e4   :  { %1378 = vsyncpa [#allocation4], 1 }
 0x3e5   :  { %1380 = vsyncpa [#allocation4 + $0x1], 1 }

</bundles_post_ra>
